<compile_context>
chip_gen: v7x
topology: tpu7x:2x2x1
jax: 0.10.0
libtpu: 0.0.40
codegen_flags: <defaults>
</compile_context>

<pallas_src>
import functools

import jax
import jax.numpy as jnp
from jax.experimental import pallas as pl
from jax.experimental.pallas import tpu as pltpu


_LANE = 128
_SUBLANE = 8
# Per-buffer budget for the batch tile of x; BlockSpec double-buffers it, so
# the x stream uses ~2x this.  Fits comfortably inside the default scoped VMEM
# on v5e (16 MiB) and v6e/v7x (32 MiB).
_X_TILE_BUDGET_BYTES = 6 * 1024 * 1024
_VMEM_LIMIT_BYTES = 32 * 1024 * 1024


def _round_up(x, m):
    return ((x + m - 1) // m) * m


def _pick_batch_tile(n, row_bytes):
    """Largest multiple-of-8 batch tile whose input slab fits the budget."""
    tn = _X_TILE_BUDGET_BYTES // max(row_bytes, 1)
    tn = max(_SUBLANE, min(512, (tn // _SUBLANE) * _SUBLANE))
    return min(tn, _round_up(n, _SUBLANE))


def _pad2(a, rows, cols):
    return jnp.pad(a, ((0, rows - a.shape[0]), (0, cols - a.shape[1])))


# ----------------------------- Pallas kernels ------------------------------

def _fused_logits_kernel(x_ref, wf_ref, bf_ref, wc_ref, bc_ref, out_ref, *,
                         inv_hw):
    """logits = relu(GAP(x) @ Wf + bf) @ Wc + bc, features kept on-chip.

    x_ref:   (tn, C, HW) f32  lane-dense spatial axis
    wf_ref:  (C, Fp)     f32
    bf_ref:  (1, Fp)     f32
    wc_ref:  (Fp, Kp)    f32
    bc_ref:  (1, Kp)     f32
    out_ref: (tn, Kp)    f32
    """
    # Lane-dense global-average-pool; scale applied once on the tiny pooled
    # tensor (tn, C) rather than per element of x.
    pooled = jnp.sum(x_ref[...], axis=-1) * inv_hw                 # (tn, C)
    feat = jnp.dot(pooled, wf_ref[...],
                   preferred_element_type=jnp.float32)             # (tn, Fp)
    feat = jnp.maximum(feat + bf_ref[...], 0.0)                    # ReLU
    logits = jnp.dot(feat, wc_ref[...],
                     preferred_element_type=jnp.float32)           # (tn, Kp)
    out_ref[...] = logits + bc_ref[...]


def _feat_kernel(x_ref, wf_ref, bf_ref, out_ref, *, inv_hw):
    """only_feat path: relu(GAP(x) @ Wf + bf)."""
    pooled = jnp.sum(x_ref[...], axis=-1) * inv_hw
    feat = jnp.dot(pooled, wf_ref[...], preferred_element_type=jnp.float32)
    out_ref[...] = jnp.maximum(feat + bf_ref[...], 0.0)


def _cls_kernel(feat_ref, wc_ref, bc_ref, out_ref):
    """only_fc path: feat @ Wc + bc."""
    logits = jnp.dot(feat_ref[...], wc_ref[...],
                     preferred_element_type=jnp.float32)
    out_ref[...] = logits + bc_ref[...]


# ------------------------------ JAX wrappers --------------------------------

def crt_net_logits(x, params):
    """Default Crt_Net path: backbone features + classifier head, fused."""
    n, c, h, w = x.shape
    hw = h * w
    f = params["w_feat"].shape[1]
    k = params["w_cls"].shape[1]
    fp = _round_up(f, _LANE)
    kp = _round_up(k, _LANE)

    x_r = jnp.reshape(x, (n, c, hw))                   # lane-dense spatial axis
    row_bytes = c * hw * x_r.dtype.itemsize
    tn = _pick_batch_tile(n, row_bytes)
    n_pad = _round_up(n, tn)
    if n_pad > n:
        x_r = jnp.pad(x_r, ((0, n_pad - n), (0, 0), (0, 0)))

    # Pad parameter lane dims to multiples of 128 (padded cols/rows are zero,
    # so the first K logits columns are exact).
    wf = _pad2(params["w_feat"], c, fp)
    bf = _pad2(params["b_feat"], 1, fp)
    wc = _pad2(params["w_cls"], fp, kp)
    bc = _pad2(params["b_cls"], 1, kp)

    cost = pl.CostEstimate(
        flops=2 * n_pad * c * fp + 2 * n_pad * fp * kp,
        transcendentals=0,
        bytes_accessed=4 * (x_r.size + wf.size + bf.size + wc.size + bc.size
                            + n_pad * kp),
    )

    out = pl.pallas_call(
        functools.partial(_fused_logits_kernel, inv_hw=1.0 / float(hw)),
        out_shape=jax.ShapeDtypeStruct((n_pad, kp), jnp.float32),
        grid=(n_pad // tn,),
        in_specs=[
            pl.BlockSpec((tn, c, hw), lambda i: (i, 0, 0)),
            pl.BlockSpec((c, fp), lambda i: (0, 0)),
            pl.BlockSpec((1, fp), lambda i: (0, 0)),
            pl.BlockSpec((fp, kp), lambda i: (0, 0)),
            pl.BlockSpec((1, kp), lambda i: (0, 0)),
        ],
        out_specs=pl.BlockSpec((tn, kp), lambda i: (i, 0)),
        compiler_params=pltpu.CompilerParams(
            dimension_semantics=("parallel",),
            vmem_limit_bytes=_VMEM_LIMIT_BYTES,
        ),
        cost_estimate=cost,
    )(x_r, wf, bf, wc, bc)
    return out[:n, :k]


def crt_net_features(x, params):
    """only_feat=True path."""
    n, c, h, w = x.shape
    hw = h * w
    f = params["w_feat"].shape[1]
    fp = _round_up(f, _LANE)

    x_r = jnp.reshape(x, (n, c, hw))
    row_bytes = c * hw * x_r.dtype.itemsize
    tn = _pick_batch_tile(n, row_bytes)
    n_pad = _round_up(n, tn)
    if n_pad > n:
        x_r = jnp.pad(x_r, ((0, n_pad - n), (0, 0), (0, 0)))

    wf = _pad2(params["w_feat"], c, fp)
    bf = _pad2(params["b_feat"], 1, fp)

    cost = pl.CostEstimate(
        flops=2 * n_pad * c * fp,
        transcendentals=0,
        bytes_accessed=4 * (x_r.size + wf.size + bf.size + n_pad * fp),
    )

    out = pl.pallas_call(
        functools.partial(_feat_kernel, inv_hw=1.0 / float(hw)),
        out_shape=jax.ShapeDtypeStruct((n_pad, fp), jnp.float32),
        grid=(n_pad // tn,),
        in_specs=[
            pl.BlockSpec((tn, c, hw), lambda i: (i, 0, 0)),
            pl.BlockSpec((c, fp), lambda i: (0, 0)),
            pl.BlockSpec((1, fp), lambda i: (0, 0)),
        ],
        out_specs=pl.BlockSpec((tn, fp), lambda i: (i, 0)),
        compiler_params=pltpu.CompilerParams(
            dimension_semantics=("parallel",),
            vmem_limit_bytes=_VMEM_LIMIT_BYTES,
        ),
        cost_estimate=cost,
    )(x_r, wf, bf)
    return out[:n, :f]


def crt_net_classifier(feat, params):
    """only_fc=True path: classifier head on pre-extracted features."""
    n, f = feat.shape
    k = params["w_cls"].shape[1]
    fp = _round_up(f, _LANE)
    kp = _round_up(k, _LANE)

    row_bytes = fp * feat.dtype.itemsize
    tn = _pick_batch_tile(n, row_bytes)
    n_pad = _round_up(n, tn)
    feat_p = jnp.pad(feat, ((0, n_pad - n), (0, fp - f)))

    wc = _pad2(params["w_cls"], fp, kp)
    bc = _pad2(params["b_cls"], 1, kp)

    cost = pl.CostEstimate(
        flops=2 * n_pad * fp * kp,
        transcendentals=0,
        bytes_accessed=4 * (feat_p.size + wc.size + bc.size + n_pad * kp),
    )

    out = pl.pallas_call(
        _cls_kernel,
        out_shape=jax.ShapeDtypeStruct((n_pad, kp), jnp.float32),
        grid=(n_pad // tn,),
        in_specs=[
            pl.BlockSpec((tn, fp), lambda i: (i, 0)),
            pl.BlockSpec((fp, kp), lambda i: (0, 0)),
            pl.BlockSpec((1, kp), lambda i: (0, 0)),
        ],
        out_specs=pl.BlockSpec((tn, kp), lambda i: (i, 0)),
        compiler_params=pltpu.CompilerParams(
            dimension_semantics=("parallel",),
            vmem_limit_bytes=_VMEM_LIMIT_BYTES,
        ),
        cost_estimate=cost,
    )(feat_p, wc, bc)
    return out[:n, :k]


def crt_net_forward(x, params, only_feat=False, only_fc=False):
    """Mirrors Crt_Net.forward semantics."""
    if only_feat:
        return crt_net_features(x, params)
    if only_fc:
        return crt_net_classifier(x, params)
    return {"logits": crt_net_logits(x, params)}


def init_params(key, num_channels, num_features, num_classes):
    k1, k2, k3, k4 = jax.random.split(key, 4)
    lim_f = 1.0 / jnp.sqrt(num_channels)
    lim_c = 1.0 / jnp.sqrt(num_features)
    return {
        "w_feat": jax.random.uniform(k1, (num_channels, num_features),
                                     jnp.float32, -lim_f, lim_f),
        "b_feat": jax.random.uniform(k2, (1, num_features),
                                     jnp.float32, -lim_f, lim_f),
        "w_cls": jax.random.uniform(k3, (num_features, num_classes),
                                    jnp.float32, -lim_c, lim_c),
        "b_cls": jax.random.uniform(k4, (1, num_classes),
                                    jnp.float32, -lim_c, lim_c),
    }


if __name__ == "__main__":
    key = jax.random.PRNGKey(0)
    kx, kp = jax.random.split(key)

    # Small shapes: batch=2, channels=4, spatial=16x16, num_features=32, 10 classes.
    N, C, H, W = 2, 4, 16, 16
    NUM_FEATURES, NUM_CLASSES = 32, 10

    x = jax.random.normal(kx, (N, C, H, W), dtype=jnp.float32)
    params = init_params(kp, C, NUM_FEATURES, NUM_CLASSES)

    # Default path: {'logits': ...} from the fused kernel.
    out = crt_net_forward(x, params)
    logits = jax.block_until_ready(out["logits"])
    assert logits.shape == (N, NUM_CLASSES)
    assert logits.dtype == jnp.float32

    # only_feat path.
    feat = jax.block_until_ready(crt_net_forward(x, params, only_feat=True))
    assert feat.shape == (N, NUM_FEATURES)

    # only_fc path (takes features).
    logits_fc = jax.block_until_ready(crt_net_forward(feat, params, only_fc=True))
    assert logits_fc.shape == (N, NUM_CLASSES)

    # Pure-JAX reference check.
    pooled_ref = jnp.mean(x.reshape(N, C, H * W), axis=-1)
    feat_ref = jnp.maximum(pooled_ref @ params["w_feat"] + params["b_feat"], 0.0)
    logits_ref = feat_ref @ params["w_cls"] + params["b_cls"]
    assert jnp.allclose(feat, feat_ref, atol=1e-5, rtol=1e-5)
    assert jnp.allclose(logits, logits_ref, atol=1e-5, rtol=1e-5)
    assert jnp.allclose(logits_fc, logits_ref, atol=1e-5, rtol=1e-5)

    print("KERNEL_OK")
</pallas_src>

<mosaic_0001>
module attributes {stable_mosaic.version = 11 : i64} {
  func.func @_fused_logits_kernel(%arg0: i32, %arg1: memref<8x4x256xf32, #tpu.memory_space<vmem>>, %arg2: memref<4x128xf32, #tpu.memory_space<vmem>>, %arg3: memref<1x128xf32, #tpu.memory_space<vmem>>, %arg4: memref<128x128xf32, #tpu.memory_space<vmem>>, %arg5: memref<1x128xf32, #tpu.memory_space<vmem>>, %arg6: memref<8x128xf32, #tpu.memory_space<vmem>>) attributes {dimension_semantics = [#tpu.dimension_semantics<parallel>], iteration_bounds = array<i64: 1>, scalar_prefetch = 0 : i64, scratch_operands = 0 : i64, tpu.core_type = #tpu.core_type<tc>, window_params = [{transform_indices = @transform_0, window_bounds = array<i64: 8, 4, 256>}, {pipeline_mode = #tpu.pipeline_mode<synchronous>, transform_indices = @transform_1, window_bounds = array<i64: 4, 128>}, {pipeline_mode = #tpu.pipeline_mode<synchronous>, transform_indices = @transform_2, window_bounds = array<i64: 1, 128>}, {pipeline_mode = #tpu.pipeline_mode<synchronous>, transform_indices = @transform_3, window_bounds = array<i64: 128, 128>}, {pipeline_mode = #tpu.pipeline_mode<synchronous>, transform_indices = @transform_4, window_bounds = array<i64: 1, 128>}, {transform_indices = @transform_5, window_bounds = array<i64: 8, 128>}]} {
    %c0 = arith.constant 0 : index
    %c0_0 = arith.constant 0 : index
    %c0_1 = arith.constant 0 : index
    %0 = vector.load %arg1[%c0, %c0_0, %c0_1] : memref<8x4x256xf32, #tpu.memory_space<vmem>>, vector<8x4x256xf32>
    %cst = arith.constant dense<0.000000e+00> : vector<8x4xf32>
    %1 = vector.multi_reduction <add>, %0, %cst [2] : vector<8x4x256xf32> to vector<8x4xf32>
    %cst_2 = arith.constant 3.906250e-03 : f32
    %2 = vector.broadcast %cst_2 : f32 to vector<8x4xf32>
    %3 = arith.mulf %1, %2 : vector<8x4xf32>
    %c0_3 = arith.constant 0 : index
    %c0_4 = arith.constant 0 : index
    %4 = vector.load %arg2[%c0_3, %c0_4] : memref<4x128xf32, #tpu.memory_space<vmem>>, vector<4x128xf32>
    %cst_5 = arith.constant dense<0.000000e+00> : vector<8x128xf32>
    %5 = tpu.matmul %3, %4, %cst_5 {dimension_numbers = #tpu.dot_dimension_numbers<[1], [0], [0], [1], [0, 0, 1, 1], [], []>} : vector<8x4xf32>, vector<4x128xf32>, vector<8x128xf32> -> vector<8x128xf32>
    %c0_6 = arith.constant 0 : index
    %c0_7 = arith.constant 0 : index
    %6 = vector.load %arg3[%c0_6, %c0_7] : memref<1x128xf32, #tpu.memory_space<vmem>>, vector<1x128xf32>
    %7 = vector.broadcast %6 : vector<1x128xf32> to vector<8x128xf32>
    %8 = arith.addf %5, %7 : vector<8x128xf32>
    %cst_8 = arith.constant 0.000000e+00 : f32
    %9 = vector.broadcast %cst_8 : f32 to vector<8x128xf32>
    %10 = arith.maximumf %8, %9 : vector<8x128xf32>
    %c0_9 = arith.constant 0 : index
    %c0_10 = arith.constant 0 : index
    %11 = vector.load %arg4[%c0_9, %c0_10] : memref<128x128xf32, #tpu.memory_space<vmem>>, vector<128x128xf32>
    %cst_11 = arith.constant dense<0.000000e+00> : vector<8x128xf32>
    %12 = tpu.matmul %10, %11, %cst_11 {dimension_numbers = #tpu.dot_dimension_numbers<[1], [0], [0], [1], [0, 0, 1, 1], [], []>} : vector<8x128xf32>, vector<128x128xf32>, vector<8x128xf32> -> vector<8x128xf32>
    %c0_12 = arith.constant 0 : index
    %c0_13 = arith.constant 0 : index
    %13 = vector.load %arg5[%c0_12, %c0_13] : memref<1x128xf32, #tpu.memory_space<vmem>>, vector<1x128xf32>
    %14 = vector.broadcast %13 : vector<1x128xf32> to vector<8x128xf32>
    %15 = arith.addf %12, %14 : vector<8x128xf32>
    %c0_14 = arith.constant 0 : index
    %c0_15 = arith.constant 0 : index
    %16 = vector.load %arg6[%c0_14, %c0_15] : memref<8x128xf32, #tpu.memory_space<vmem>>, vector<8x128xf32>
    tpu.vector_store %arg6[%c0_14, %c0_15], %15 {strides = array<i32>} : memref<8x128xf32, #tpu.memory_space<vmem>>, vector<8x128xf32>,
    return
  }
  func.func @transform_0(%arg0: i32) -> (i32, i32, i32) {
    %c0_i32 = arith.constant 0 : i32
    %c0_i32_0 = arith.constant 0 : i32
    %c0_i32_1 = arith.constant 0 : i32
    return %arg0, %c0_i32, %c0_i32_0 : i32, i32, i32
  }
  func.func @transform_1(%arg0: i32) -> (i32, i32) {
    %c0_i32 = arith.constant 0 : i32
    %c0_i32_0 = arith.constant 0 : i32
    %c0_i32_1 = arith.constant 0 : i32
    return %c0_i32, %c0_i32_0 : i32, i32
  }
  func.func @transform_2(%arg0: i32) -> (i32, i32) {
    %c0_i32 = arith.constant 0 : i32
    %c0_i32_0 = arith.constant 0 : i32
    %c0_i32_1 = arith.constant 0 : i32
    return %c0_i32, %c0_i32_0 : i32, i32
  }
  func.func @transform_3(%arg0: i32) -> (i32, i32) {
    %c0_i32 = arith.constant 0 : i32
    %c0_i32_0 = arith.constant 0 : i32
    %c0_i32_1 = arith.constant 0 : i32
    return %c0_i32, %c0_i32_0 : i32, i32
  }
  func.func @transform_4(%arg0: i32) -> (i32, i32) {
    %c0_i32 = arith.constant 0 : i32
    %c0_i32_0 = arith.constant 0 : i32
    %c0_i32_1 = arith.constant 0 : i32
    return %c0_i32, %c0_i32_0 : i32, i32
  }
  func.func @transform_5(%arg0: i32) -> (i32, i32) {
    %c0_i32 = arith.constant 0 : i32
    %c0_i32_0 = arith.constant 0 : i32
    return %arg0, %c0_i32 : i32, i32
  }
}

</mosaic_0001>

<bundles_post_ra>
// kernel: tpu_custom_call.1
= control target key start
LH: loop header
LB: loop body
LE: loop exit
PB: predicated region body
PF: predicated region fallthrough
CT: control target
= control target key end

     0   :  { %10 = vsyncpa [#allocation3], 0  ;;  %s707_s0 = inlined_call_operand.hbm [shape: f32[8,4,256], index: 0, kind: input, shape index: {}]   ;;  %s708_s1 = inlined_call_operand.hbm [shape: f32[4,128], index: 1, kind: input, shape index: {}]   ;;  %s709_s2 = inlined_call_operand.vmem [shape: f32[1,128], index: 2, kind: input, shape index: {}]   ;;  %s710_s3 = inlined_call_operand.hbm [shape: f32[128,128], index: 3, kind: input, shape index: {}]   ;;  %s711_s4 = inlined_call_operand.vmem [shape: f32[1,128], index: 4, kind: input, shape index: {}]   ;;  %s712_s5 = inlined_call_operand.hbm [shape: f32[8,128], index: 5, kind: output, shape index: {}]  }
   0x1   :  { %11 = vsyncpa [#allocation6], 0 }
   0x2   :  { %12 = vsyncpa [#allocation4], 0  ;;  %s590_s18 = smov [#allocation5]   ;;  %s591_s20 = smov [#allocation2]  }
   0x3   :  { %s31_s19 = sshll.u32 %s590_s18, 4  ;;  %s18_s21 = sshll.u32 %s591_s20, 4  ;;  %s32_s19 = int_to_ptr.vmem [resolvable:$true] %s31_s19  ;;  %s629_s21 = int_to_ptr.vmem [resolvable:$true] %s18_s21 }
   0x4   :  { %s496_s24 = scalar_lea.hbm %s708_s1, 64 }
   0x5   :  { %p497_p0 = scmp.ne.s32.totalorder %s708_s1, %s496_s24  ;;  %p500_p1 = scmp.lt.u32.totalorder %s496_s24, %s708_s1 }
   0x7   :  { %p502_p2 = pnand %p500_p1, %p497_p0 }
   0x9   :  { %505 = shalt.err (!%p502_p2)
}
   0xa   :  { %s506_s29 = scalar_lea.vmem %s32_s19, 64  ;;  %p511_p4 = scmp.lt.s32.totalorder %s32_s19, %s32_s19 }
   0xb   :  { %p507_p3 = scmp.ne.s32.totalorder %s32_s19, %s506_s29  ;;  %p512_p5 = scmp.lt.s32.totalorder %s506_s29, %s506_s29 }
   0xd   :  { %p513_p6 = por %p512_p5, %p511_p4 }
   0xf   :  { %p514_p7 = pnand %p513_p6, %p507_p3 }
  0x11   :  { %517 = shalt.err (!%p514_p7)
}
  0x12   :  { %34 = dma.hbm_to_vmem [thread:$0]  %s708_s1, 64, %s32_s19, [#allocation6]  }
  0x13   :  { %s518_s9 = scalar_lea.hbm %s707_s0, 1024 }
  0x14   :  { %p519_p8 = scmp.ne.s32.totalorder %s707_s0, %s518_s9  ;;  %p522_p9 = scmp.lt.u32.totalorder %s518_s9, %s707_s0 }
  0x16   :  { %p524_p10 = pnand %p522_p9, %p519_p8 }
  0x18   :  { %527 = shalt.err (!%p524_p10)
}
  0x19   :  { %s528_s14 = scalar_lea.vmem %s629_s21, 1024  ;;  %p533_p12 = scmp.lt.s32.totalorder %s629_s21, %s629_s21 }
  0x1a   :  { %p529_p11 = scmp.ne.s32.totalorder %s629_s21, %s528_s14  ;;  %p534_p13 = scmp.lt.s32.totalorder %s528_s14, %s528_s14 }
  0x1c   :  { %p535_p0 = por %p534_p13, %p533_p12 }
  0x1e   :  { %p536_p1 = pnand %p535_p0, %p529_p11 }
  0x20   :  { %539 = shalt.err (!%p536_p1)
}
  0x21   :  { %s592_s1 = smov 128   ;;  %s593_s15 = smov 8  }
  0x22   :  { %24 = dma.hbm_to_vmem [thread:$0]  %s707_s0, 1024, %s629_s21, [#allocation3], %s592_s1, %s592_s1, %s593_s15  }
  0x23   :  { %s594_s18 = smov [#allocation7]   ;;  %s540_s23 = scalar_lea.hbm %s710_s3, 2048 }
  0x24   :  { %s42_s19 = sshll.u32 %s594_s18, 4  ;;  %p541_p2 = scmp.ne.s32.totalorder %s710_s3, %s540_s23  ;;  %s43_s19 = int_to_ptr.vmem [resolvable:$true] %s42_s19 }
  0x25   :  { %p544_p3 = scmp.lt.u32.totalorder %s540_s23, %s710_s3 }
  0x27   :  { %p546_p4 = pnand %p544_p3, %p541_p2 }
  0x29   :  { %549 = shalt.err (!%p546_p4)
}
  0x2a   :  { %s550_s28 = scalar_lea.vmem %s43_s19, 2048  ;;  %p555_p6 = scmp.lt.s32.totalorder %s43_s19, %s43_s19 }
  0x2b   :  { %p551_p5 = scmp.ne.s32.totalorder %s43_s19, %s550_s28  ;;  %p556_p7 = scmp.lt.s32.totalorder %s550_s28, %s550_s28 }
  0x2d   :  { %p557_p8 = por %p556_p7, %p555_p6 }
  0x2f   :  { %p558_p9 = pnand %p557_p8, %p551_p5 }
  0x31   :  { %561 = shalt.err (!%p558_p9)
}
  0x32   :  { %48 = dma.hbm_to_vmem [thread:$0]  %s710_s3, 2048, %s43_s19, [#allocation6], %s592_s1, %s592_s1, %s593_s15  }
  0x33   :  { %584 = dma.done.wait [#allocation3], 1024  }
  0x34   :  { %585 = vsyncadd [#allocation3], 4294966272 }
  0x35   :  { %586 = dma.done.wait [#allocation6], 2112  }
  0x36   :  { %587 = vsyncadd [#allocation6], 4294965184  ;;  %vm92_vm0 = vcmask 1043456   ;;  %v60_v0 = vld [vmem:[#allocation2] sm:$0xff]  ;;  %v62_v1 = vld [vmem:[#allocation2 + $0x10] sm:$0xff]  ;;  %v595_v41 = vmov 0.0  }
  0x37   :  { %v61_v2 = vld [vmem:[#allocation2 + $0x8] sm:$0xff]  ;;  %v76_v3 = vcombine.high %v60_v0, %v60_v0  ;;  %v93_v4 = vsel %vm92_vm0, %v60_v0, 0.0  ;;  %v78_v5 = vcombine.high %v62_v1, %v62_v1  ;;  %v103_v6 = vsel %vm92_vm0, %v62_v1, 0.0  ;;  %v63_v7 = vld [vmem:[#allocation2 + $0x18] sm:$0xff]  ;;  %v64_v8 = vld [vmem:[#allocation2 + $0x20] sm:$0xff]  ;;  %415 = vmatprep.subr.mxu0 %v595_v41  ;;  %s598_s7 = smov [#allocation8]  }
  0x38   :  { %v77_v9 = vcombine.high %v61_v2, %v61_v2  ;;  %v98_v10 = vsel %vm92_vm0, %v61_v2, 0.0  ;;  %v79_v11 = vcombine.high %v63_v7, %v63_v7  ;;  %v65_v12 = vld [vmem:[#allocation2 + $0x28] sm:$0xff]  ;;  %v108_v15 = vsel %vm92_vm0, %v63_v7, 0.0  ;;  %v66_v21 = vld [vmem:[#allocation2 + $0x30] sm:$0xff]  ;;  %v67_v22 = vld [vmem:[#allocation2 + $0x38] sm:$0xff]  ;;  %s382_s8 = sshll.u32 %s598_s7, 4  ;;  %s383_s8 = int_to_ptr.vmem [resolvable:$true] %s382_s8 }
  0x39   :  { %v94_v13 = vsel %vm92_vm0, %v76_v3, 0.0  ;;  %v104_v14 = vsel %vm92_vm0, %v78_v5, 0.0  ;;  %v80_v16 = vcombine.high %v64_v8, %v64_v8  ;;  %v81_v23 = vcombine.high %v65_v12, %v65_v12  ;;  %v141_v40 = vld [vmem:[#allocation5] sm:$0xf]  ;;  %v282_v42 = vld [vmem:[#allocation7] sm:$0xff]  ;;  %v283_v43 = vld [vmem:[#allocation7 + $0x8] sm:$0xff]  ;;  %p567_p11 = scmp.lt.s32.totalorder %s383_s8, %s383_s8 }
  0x3a   :  { %v95_v17 = vadd.f32 %v94_v13, %v93_v4  ;;  %v105_v18 = vadd.f32 %v104_v14, %v103_v6  ;;  %v99_v19 = vsel %vm92_vm0, %v77_v9, 0.0  ;;  %v109_v20 = vsel %vm92_vm0, %v79_v11, 0.0  ;;  %416 = vmatpush3.msk.msra.mxu0 %vm92_vm0, %v141_v40  ;;  %v284_v44 = vld [vmem:[#allocation7 + $0x10] sm:$0xff]  ;;  %v285_v47 = vld [vmem:[#allocation7 + $0x18] sm:$0xff]  ;;  %v286_v49 = vld [vmem:[#allocation7 + $0x20] sm:$0xff]  ;;  %s562_s9 = scalar_lea.vmem %s383_s8, 128 }
  0x3b   :  { %v100_v24 = vadd.f32 %v99_v19, %v98_v10  ;;  %v110_v25 = vadd.f32 %v109_v20, %v108_v15  ;;  %v113_v26 = vsel %vm92_vm0, %v64_v8, 0.0  ;;  %v114_v27 = vsel %vm92_vm0, %v80_v16, 0.0  ;;  %v287_v50 = vld [vmem:[#allocation7 + $0x28] sm:$0xff]  ;;  %v288_v52 = vld [vmem:[#allocation7 + $0x30] sm:$0xff]  ;;  %v289_v53 = vld [vmem:[#allocation7 + $0x38] sm:$0xff]  ;;  %p563_p10 = scmp.ne.s32.totalorder %s383_s8, %s562_s9  ;;  %p568_p12 = scmp.lt.s32.totalorder %s562_s9, %s562_s9 }
  0x3c   :  { %96 = vadd.xlane.f32.xlu0 %v95_v17  ;;  %106 = vadd.xlane.f32.xlu1 %v105_v18  ;;  %v118_v28 = vsel %vm92_vm0, %v65_v12, 0.0  ;;  %v119_v29 = vsel %vm92_vm0, %v81_v23, 0.0  ;;  %v82_v30 = vcombine.high %v66_v21, %v66_v21  ;;  %v83_v31 = vcombine.high %v67_v22, %v67_v22  ;;  %v290_v55 = vld [vmem:[#allocation7 + $0x40] sm:$0xff]  ;;  %v291_v56 = vld [vmem:[#allocation7 + $0x48] sm:$0xff]  ;;  %v292_v58 = vld [vmem:[#allocation7 + $0x50] sm:$0xff] }
  0x3d   :  { %v115_v32 = vadd.f32 %v114_v27, %v113_v26  ;;  %v120_v33 = vadd.f32 %v119_v29, %v118_v28  ;;  %v123_v34 = vsel %vm92_vm0, %v66_v21, 0.0  ;;  %v128_v36 = vsel %vm92_vm0, %v67_v22, 0.0  ;;  %v293_v59 = vld [vmem:[#allocation7 + $0x58] sm:$0xff]  ;;  %v294_v61 = vld [vmem:[#allocation7 + $0x60] sm:$0xff]  ;;  %v295_v62 = vld [vmem:[#allocation7 + $0x68] sm:$0xff]  ;;  %p569_p13 = por %p568_p12, %p567_p11 }
  0x3e   :  { %v124_v35 = vsel %vm92_vm0, %v82_v30, 0.0  ;;  %v129_v37 = vsel %vm92_vm0, %v83_v31, 0.0  ;;  %vm596_vm1 = vmmov 0   ;;  %v597_v45 = vmov 0.0|0.0  }
  0x3f   :  { %v125_v38 = vadd.f32 %v124_v35, %v123_v34  ;;  %v130_v39 = vadd.f32 %v129_v37, %v128_v36  ;;  %417 = vmatprep.mubr.msk.f32.mxu0 %vm596_vm1, %v595_v41  ;;  %452 = vmatprep.mubr.msk.f32.mxu1 %vm596_vm1, %v595_v41  ;;  %v456_v46 = vpack.c.bf16 %v283_v43, %v282_v42  ;;  %v157_v0 = vlaneseq  ;;  %v296_v35 = vld [vmem:[#allocation7 + $0x70] sm:$0xff]  ;;  %v297_v36 = vld [vmem:[#allocation7 + $0x78] sm:$0xff]  ;;  %p570_p0 = pnand %p569_p13, %p563_p10 }
  0x40   :  { %101 = vadd.xlane.f32.xlu0 %v100_v24  ;;  %111 = vadd.xlane.f32.xlu1 %v110_v25  ;;  %v459_v48 = vpack.c.bf16 %v285_v47, %v284_v44  ;;  %v462_v51 = vpack.c.bf16 %v287_v50, %v286_v49  ;;  %v465_v54 = vpack.c.bf16 %v289_v53, %v288_v52  ;;  %vm191_vm2 = vcmask 1041409   ;;  %v395_v43 = vld [vmem:[%s711_s4] ss:$0 sm:$0xff] }
  0x41   :  { %455 = vmatprep.subr.bf16.mxu1 %v597_v45  ;;  %v468_v57 = vpack.c.bf16 %v291_v56, %v290_v55  ;;  %v471_v60 = vpack.c.bf16 %v293_v59, %v292_v58  ;;  %v474_v63 = vpack.c.bf16 %v295_v62, %v294_v61  ;;  %v158_v1 = vand.u32 127, %v157_v0 }
  0x42   :  { %457 = vmatpush3.bf16.msra.mxu1 %v456_v46  ;;  %v160_v2 = vshrl.u32 %v157_v0, 7  ;;  %vm193_vm3 = vcmask 1042434   ;;  %vm195_vm4 = vcmask 1043459   ;;  %vm197_vm5 = vcmask 1044484  }
  0x43   :  { %458 = vmatprep.subr.bf16.mxu1 %v597_v45  ;;  %vm199_vm6 = vcmask 1045509   ;;  %vm201_vm7 = vcmask 1046534   ;;  %vm203_vm8 = vcmask 1047559   ;;  %vm205_vm9 = vcmask 31744  }
  0x44   :  { %116 = vadd.xlane.f32.xlu0 %v115_v32  ;;  %121 = vadd.xlane.f32.xlu1 %v120_v33  ;;  %v161_v5 = vsub.s32 %v158_v1, %v160_v2  ;;  %v477_v37 = vpack.c.bf16 %v297_v36, %v296_v35 }
  0x46   :  { %460 = vmatpush3.bf16.msra.mxu1 %v459_v48 }
  0x47   :  { %461 = vmatprep.subr.bf16.mxu1 %v597_v45 }
  0x48   :  { %126 = vadd.xlane.f32.xlu0 %v125_v38  ;;  %131 = vadd.xlane.f32.xlu1 %v130_v39  ;;  %v392_v38 = vld [vmem:[%s709_s2] ss:$0 sm:$0xff] }
  0x4a   :  { %463 = vmatpush3.bf16.msra.mxu1 %v462_v51 }
  0x4b   :  { %464 = vmatprep.subr.bf16.mxu1 %v597_v45 }
  0x4e   :  { %466 = vmatpush3.bf16.msra.mxu1 %v465_v54 }
  0x4f   :  { %467 = vmatprep.subr.bf16.mxu1 %v597_v45 }
  0x52   :  { %469 = vmatpush3.bf16.msra.mxu1 %v468_v57 }
  0x53   :  { %470 = vmatprep.subr.bf16.mxu1 %v597_v45 }
  0x56   :  { %472 = vmatpush3.bf16.msra.mxu1 %v471_v60 }
  0x57   :  { %473 = vmatprep.subr.bf16.mxu1 %v597_v45 }
  0x5a   :  { %475 = vmatpush3.bf16.msra.mxu1 %v474_v63 }
  0x5b   :  { %476 = vmatprep.subr.bf16.mxu1 %v597_v45 }
  0x5e   :  { %478 = vmatpush3.bf16.msra.mxu1 %v477_v37 }
  0xc9   :  { %v97_v3 = vpop.xlane.xlu0 %96  ;;  %v107_v4 = vpop.xlane.xlu1 %106 }
  0xca   :  { %v133_v6 = vmul.f32 0.00390625, %v97_v3  ;;  %v135_v7 = vmul.f32 0.00390625, %v107_v4 }
  0xcc   :  { %v162_v12 = vrot.slane %v133_v6, %v161_v5  ;;  %v170_v15 = vrot.slane %v135_v7, %v161_v5 }
  0xcd   :  { %v102_v8 = vpop.xlane.xlu0 %101  ;;  %v112_v9 = vpop.xlane.xlu1 %111 }
  0xce   :  { %v134_v10 = vmul.f32 0.00390625, %v102_v8  ;;  %v136_v11 = vmul.f32 0.00390625, %v112_v9 }
  0xd0   :  { %v166_v13 = vrot.slane %v134_v10, %v161_v5  ;;  %v174_v14 = vrot.slane %v136_v11, %v161_v5 }
  0xd1   :  { %v117_v16 = vpop.xlane.xlu0 %116  ;;  %v122_v17 = vpop.xlane.xlu1 %121 }
  0xd2   :  { %v192_v18 = vsel %vm191_vm2, %v166_v13, %v162_v12  ;;  %v137_v19 = vmul.f32 0.00390625, %v117_v16  ;;  %v138_v20 = vmul.f32 0.00390625, %v122_v17 }
  0xd3   :  { %v194_v21 = vsel %vm193_vm3, %v170_v15, %v192_v18 }
  0xd4   :  { %v196_v22 = vsel %vm195_vm4, %v174_v14, %v194_v21  ;;  %v178_v23 = vrot.slane %v137_v19, %v161_v5  ;;  %v182_v24 = vrot.slane %v138_v20, %v161_v5 }
  0xd5   :  { %v127_v25 = vpop.xlane.xlu0 %126  ;;  %v132_v26 = vpop.xlane.xlu1 %131 }
  0xd6   :  { %v198_v27 = vsel %vm197_vm5, %v178_v23, %v196_v22  ;;  %v139_v28 = vmul.f32 0.00390625, %v127_v25  ;;  %v140_v29 = vmul.f32 0.00390625, %v132_v26 }
  0xd7   :  { %v200_v32 = vsel %vm199_vm6, %v182_v24, %v198_v27 }
  0xd8   :  { %v186_v30 = vrot.slane %v139_v28, %v161_v5  ;;  %v190_v31 = vrot.slane %v140_v29, %v161_v5 }
  0xda   :  { %v202_v33 = vsel %vm201_vm7, %v186_v30, %v200_v32 }
  0xdb   :  { %v204_v34 = vsel %vm203_vm8, %v190_v31, %v202_v33 }
  0xdc   :  { %418 = vmatmul.mubr.msk.f32.vlgmr.msra.gmra.mrb[0].mxu0 %vm205_vm9, %v204_v34 }
 0x1af   :  { %v277_v39 = vpop.f32.mrb[0].mxu0 }
 0x1b0   :  { %v278_v40 = vadd.f32 %v392_v38, %v277_v39  ;;  %v419_v41 = vpop.f32.mrb[1].mxu0 }
 0x1b2   :  { %v281_v42 = vmax.f32 %v278_v40, 0.0 }
 0x1b4   :  { %453 = vmatmul.mubr.f32.vlgmr.msra.gmra.mrb[0].mxu1 %v281_v42 }
 0x287   :  { %v371_v44 = vpop.f32.mrb[0].mxu1 }
 0x288   :  { %v372_v45 = vadd.f32 %v395_v43, %v371_v44  ;;  %v454_v46 = vpop.f32.mrb[1].mxu1 }
 0x28a   :  { %375 = vst [vmem:[#allocation8] sm:$0xff] %v372_v45 }
 0x28b   :  { %573 = shalt.err (!%p570_p0)
}
 0x28c   :  { %s574_s11 = scalar_lea.hbm %s712_s5, 128 }
 0x28d   :  { %p575_p1 = scmp.ne.s32.totalorder %s712_s5, %s574_s11  ;;  %p578_p2 = scmp.lt.u32.totalorder %s574_s11, %s712_s5 }
 0x28f   :  { %p580_p3 = pnand %p578_p2, %p575_p1 }
 0x291   :  { %583 = shalt.err (!%p580_p3)
}
 0x292   :  { %385 = dma.vmem_to_hbm [thread:$0]  %s383_s8, 128, %s712_s5, [#allocation4]  }
 0x293   :  { %588 = dma.done.wait [#allocation4], 128  }
 0x294   :  { %589 = vsyncadd [#allocation4], 4294967168 }
 0x295   :  { %389 = vsyncpa [#allocation3], 1 }
 0x296   :  { %390 = vsyncpa [#allocation6], 1 }
 0x297   :  { %391 = vsyncpa [#allocation4], 1 }

</bundles_post_ra>
